<compile_context>
chip_gen: v5e
topology: v5e:2x2
jax: 0.10.0
libtpu: 0.0.40
codegen_flags: <defaults>
</compile_context>

<pallas_src>
import jax
import jax.numpy as jnp
from jax.experimental import pallas as pl
from jax.experimental.pallas import tpu as pltpu

LANE = 128      # vreg lane width
SUBLANE = 8     # vreg sublane count (f32)


def _round_up(n, m):
    return ((n + m - 1) // m) * m


def mlp_kernel(x_ref, w1_ref, b1_ref, w2_ref, b2_ref, o_ref):
    # x tile: (TB, Dp) f32 -> bf16 operands for the MXU, f32 accumulation.
    x = x_ref[...].astype(jnp.bfloat16)
    # Linear 1: (TB, Dp) @ (Dp, Hp) -> f32
    h = jnp.dot(x, w1_ref[...], preferred_element_type=jnp.float32)
    # Bias + ReLU in f32 (VPU; v5e has no bf16 VPU path).
    h = jnp.maximum(h + b1_ref[...], 0.0)
    # Linear 2: (TB, Hp) @ (Hp, Dp) -> f32
    y = jnp.dot(h.astype(jnp.bfloat16), w2_ref[...], preferred_element_type=jnp.float32)
    y = y + b2_ref[...]
    # Sigmoid: exp on EUP, approx reciprocal also on EUP -> near-free under the MXU.
    o_ref[...] = pl.reciprocal(1.0 + jnp.exp(-y), approx=True).astype(o_ref.dtype)


def mlp_forward(x, w1_t, b1, w2_t, b2, *, block_batch=512):
    """x: (B, D_in) f32; w1_t: (D_in, H); b1: (1, H); w2_t: (H, D_in); b2: (1, D_in)."""
    B, D_in = x.shape
    H = w1_t.shape[1]

    # Lane-dense padded sizes.
    Dp = _round_up(max(D_in, LANE), LANE)
    Hp = _round_up(max(H, LANE), LANE)
    TB = min(block_batch, _round_up(B, SUBLANE))
    Bp = _round_up(B, TB)

    # Zero-pad once (in practice weights would be stored pre-padded / bf16).
    xp = jnp.zeros((Bp, Dp), jnp.float32).at[:B, :D_in].set(x.astype(jnp.float32))
    w1p = jnp.zeros((Dp, Hp), jnp.bfloat16).at[:D_in, :H].set(w1_t.astype(jnp.bfloat16))
    b1p = jnp.zeros((1, Hp), jnp.float32).at[:, :H].set(b1.astype(jnp.float32))
    w2p = jnp.zeros((Hp, Dp), jnp.bfloat16).at[:H, :D_in].set(w2_t.astype(jnp.bfloat16))
    b2p = jnp.zeros((1, Dp), jnp.float32).at[:, :D_in].set(b2.astype(jnp.float32))

    grid = (Bp // TB,)
    out_padded = pl.pallas_call(
        mlp_kernel,
        out_shape=jax.ShapeDtypeStruct((Bp, Dp), jnp.float32),
        grid=grid,
        in_specs=[
            pl.BlockSpec((TB, Dp), lambda i: (i, 0)),   # x: tiled over batch
            pl.BlockSpec((Dp, Hp), lambda i: (0, 0)),   # W1: resident across batch tiles
            pl.BlockSpec((1, Hp), lambda i: (0, 0)),    # b1: resident
            pl.BlockSpec((Hp, Dp), lambda i: (0, 0)),   # W2: resident
            pl.BlockSpec((1, Dp), lambda i: (0, 0)),    # b2: resident
        ],
        out_specs=pl.BlockSpec((TB, Dp), lambda i: (i, 0)),
        compiler_params=pltpu.CompilerParams(
            dimension_semantics=("parallel",),          # batch tiles across TCs (v7x)
            vmem_limit_bytes=32 * 1024 * 1024,          # headroom vs v7x 64 MiB physical
        ),
    )(xp, w1p, b1p, w2p, b2p)

    # Strip padding back to logical shape.
    return out_padded[:B, :D_in].astype(x.dtype)


def init_linear_params(key, in_features, out_features, dtype=jnp.float32):
    """Deterministic init mimicking nn.Linear: U(-1/sqrt(fan_in), 1/sqrt(fan_in)).
    Stored pre-transposed as (in_features, out_features)."""
    k_w, k_b = jax.random.split(key)
    bound = 1.0 / float(in_features) ** 0.5
    w_t = jax.random.uniform(k_w, (in_features, out_features), dtype,
                             minval=-bound, maxval=bound)
    b = jax.random.uniform(k_b, (1, out_features), dtype,
                           minval=-bound, maxval=bound)
    return w_t, b


if __name__ == "__main__":
    # Small shapes consistent with MultilayerPerceptron(input_size, hidden_size).
    batch = 8
    input_size = 16
    hidden_size = 32

    key = jax.random.PRNGKey(0)
    k_x, k_l1, k_l2 = jax.random.split(key, 3)

    x = jax.random.normal(k_x, (batch, input_size), jnp.float32)
    w1_t, b1 = init_linear_params(k_l1, input_size, hidden_size)
    w2_t, b2 = init_linear_params(k_l2, hidden_size, input_size)

    out = mlp_forward(x, w1_t, b1, w2_t, b2)
    out = jax.block_until_ready(out)

    # Reference in plain f32 JAX (same math as the PyTorch forward).
    ref = jax.nn.sigmoid(jnp.maximum(x @ w1_t + b1, 0.0) @ w2_t + b2)
    assert out.shape == (batch, input_size)
    # Tolerance accounts for bf16 matmul operands + approx reciprocal.
    assert jnp.allclose(out, ref, atol=2e-2, rtol=2e-2), float(jnp.max(jnp.abs(out - ref)))

    print("KERNEL_OK")
</pallas_src>

<mosaic_0001>
module attributes {stable_mosaic.version = 11 : i64} {
  func.func @mlp_kernel(%arg0: i32, %arg1: memref<8x128xf32, #tpu.memory_space<vmem>>, %arg2: memref<128x128xbf16, #tpu.memory_space<vmem>>, %arg3: memref<1x128xf32, #tpu.memory_space<vmem>>, %arg4: memref<128x128xbf16, #tpu.memory_space<vmem>>, %arg5: memref<1x128xf32, #tpu.memory_space<vmem>>, %arg6: memref<8x128xf32, #tpu.memory_space<vmem>>) attributes {dimension_semantics = [#tpu.dimension_semantics<parallel>], iteration_bounds = array<i64: 1>, scalar_prefetch = 0 : i64, scratch_operands = 0 : i64, tpu.core_type = #tpu.core_type<tc>, window_params = [{transform_indices = @transform_0, window_bounds = array<i64: 8, 128>}, {pipeline_mode = #tpu.pipeline_mode<synchronous>, transform_indices = @transform_1, window_bounds = array<i64: 128, 128>}, {pipeline_mode = #tpu.pipeline_mode<synchronous>, transform_indices = @transform_2, window_bounds = array<i64: 1, 128>}, {pipeline_mode = #tpu.pipeline_mode<synchronous>, transform_indices = @transform_3, window_bounds = array<i64: 128, 128>}, {pipeline_mode = #tpu.pipeline_mode<synchronous>, transform_indices = @transform_4, window_bounds = array<i64: 1, 128>}, {transform_indices = @transform_5, window_bounds = array<i64: 8, 128>}]} {
    %c0 = arith.constant 0 : index
    %c0_0 = arith.constant 0 : index
    %0 = vector.load %arg1[%c0, %c0_0] : memref<8x128xf32, #tpu.memory_space<vmem>>, vector<8x128xf32>
    %1 = arith.truncf %0 : vector<8x128xf32> to vector<8x128xbf16>
    %c0_1 = arith.constant 0 : index
    %c0_2 = arith.constant 0 : index
    %2 = vector.load %arg2[%c0_1, %c0_2] : memref<128x128xbf16, #tpu.memory_space<vmem>>, vector<128x128xbf16>
    %cst = arith.constant dense<0.000000e+00> : vector<8x128xf32>
    %3 = tpu.matmul %1, %2, %cst {dimension_numbers = #tpu.dot_dimension_numbers<[1], [0], [0], [1], [0, 0, 1, 1], [], []>} : vector<8x128xbf16>, vector<128x128xbf16>, vector<8x128xf32> -> vector<8x128xf32>
    %c0_3 = arith.constant 0 : index
    %c0_4 = arith.constant 0 : index
    %4 = vector.load %arg3[%c0_3, %c0_4] : memref<1x128xf32, #tpu.memory_space<vmem>>, vector<1x128xf32>
    %5 = vector.broadcast %4 : vector<1x128xf32> to vector<8x128xf32>
    %6 = arith.addf %3, %5 : vector<8x128xf32>
    %cst_5 = arith.constant 0.000000e+00 : f32
    %7 = vector.broadcast %cst_5 : f32 to vector<8x128xf32>
    %8 = arith.maximumf %6, %7 : vector<8x128xf32>
    %9 = arith.truncf %8 : vector<8x128xf32> to vector<8x128xbf16>
    %c0_6 = arith.constant 0 : index
    %c0_7 = arith.constant 0 : index
    %10 = vector.load %arg4[%c0_6, %c0_7] : memref<128x128xbf16, #tpu.memory_space<vmem>>, vector<128x128xbf16>
    %cst_8 = arith.constant dense<0.000000e+00> : vector<8x128xf32>
    %11 = tpu.matmul %9, %10, %cst_8 {dimension_numbers = #tpu.dot_dimension_numbers<[1], [0], [0], [1], [0, 0, 1, 1], [], []>} : vector<8x128xbf16>, vector<128x128xbf16>, vector<8x128xf32> -> vector<8x128xf32>
    %c0_9 = arith.constant 0 : index
    %c0_10 = arith.constant 0 : index
    %12 = vector.load %arg5[%c0_9, %c0_10] : memref<1x128xf32, #tpu.memory_space<vmem>>, vector<1x128xf32>
    %13 = vector.broadcast %12 : vector<1x128xf32> to vector<8x128xf32>
    %14 = arith.addf %11, %13 : vector<8x128xf32>
    %cst_11 = arith.constant 0.000000e+00 : f32
    %15 = vector.broadcast %cst_11 : f32 to vector<8x128xf32>
    %16 = arith.subf %15, %14 : vector<8x128xf32>
    %17 = math.exp %16 : vector<8x128xf32>
    %cst_12 = arith.constant 1.000000e+00 : f32
    %18 = vector.broadcast %cst_12 : f32 to vector<8x128xf32>
    %19 = arith.addf %18, %17 : vector<8x128xf32>
    %20 = tpu.reciprocal %19 {approx = true} : vector<8x128xf32> -> vector<8x128xf32>
    %c0_13 = arith.constant 0 : index
    %c0_14 = arith.constant 0 : index
    %21 = vector.load %arg6[%c0_13, %c0_14] : memref<8x128xf32, #tpu.memory_space<vmem>>, vector<8x128xf32>
    tpu.vector_store %arg6[%c0_13, %c0_14], %20 {strides = array<i32>} : memref<8x128xf32, #tpu.memory_space<vmem>>, vector<8x128xf32>,
    return
  }
  func.func @transform_0(%arg0: i32) -> (i32, i32) {
    %c0_i32 = arith.constant 0 : i32
    %c0_i32_0 = arith.constant 0 : i32
    return %arg0, %c0_i32 : i32, i32
  }
  func.func @transform_1(%arg0: i32) -> (i32, i32) {
    %c0_i32 = arith.constant 0 : i32
    %c0_i32_0 = arith.constant 0 : i32
    %c0_i32_1 = arith.constant 0 : i32
    return %c0_i32, %c0_i32_0 : i32, i32
  }
  func.func @transform_2(%arg0: i32) -> (i32, i32) {
    %c0_i32 = arith.constant 0 : i32
    %c0_i32_0 = arith.constant 0 : i32
    %c0_i32_1 = arith.constant 0 : i32
    return %c0_i32, %c0_i32_0 : i32, i32
  }
  func.func @transform_3(%arg0: i32) -> (i32, i32) {
    %c0_i32 = arith.constant 0 : i32
    %c0_i32_0 = arith.constant 0 : i32
    %c0_i32_1 = arith.constant 0 : i32
    return %c0_i32, %c0_i32_0 : i32, i32
  }
  func.func @transform_4(%arg0: i32) -> (i32, i32) {
    %c0_i32 = arith.constant 0 : i32
    %c0_i32_0 = arith.constant 0 : i32
    %c0_i32_1 = arith.constant 0 : i32
    return %c0_i32, %c0_i32_0 : i32, i32
  }
  func.func @transform_5(%arg0: i32) -> (i32, i32) {
    %c0_i32 = arith.constant 0 : i32
    %c0_i32_0 = arith.constant 0 : i32
    return %arg0, %c0_i32 : i32, i32
  }
}

</mosaic_0001>

<bundles_post_ra>
// kernel: tpu_custom_call.1
= control target key start
LH: loop header
LB: loop body
LE: loop exit
PB: predicated region body
PF: predicated region fallthrough
CT: control target
= control target key end

     0   :  { %10 = vsyncpa [#allocation3], 0  ;;  %s504_s0 = inlined_call_operand.hbm [shape: f32[8,128], index: 0, kind: input, shape index: {}]   ;;  %s505_s1 = inlined_call_operand.hbm [shape: bf16[128,128], index: 1, kind: input, shape index: {}]   ;;  %s506_s2 = inlined_call_operand.vmem [shape: f32[1,128], index: 2, kind: input, shape index: {}]   ;;  %s507_s3 = inlined_call_operand.hbm [shape: bf16[128,128], index: 3, kind: input, shape index: {}]   ;;  %s508_s4 = inlined_call_operand.vmem [shape: f32[1,128], index: 4, kind: input, shape index: {}]   ;;  %s509_s5 = inlined_call_operand.hbm [shape: f32[8,128], index: 5, kind: output, shape index: {}]  }
   0x1   :  { %11 = vsyncpa [#allocation6], 0  ;;  %s28_s20 = sshll.u32 %s505_s1, 4  ;;  %s29_s20 = int_to_ptr.hbm [resolvable:$true] %s28_s20 }
   0x2   :  { %12 = vsyncpa [#allocation4], 0  ;;  %s450_s21 = smov [#allocation5]   ;;  %s18_s25 = sshll.u32 %s504_s0, 4  ;;  %s19_s25 = int_to_ptr.hbm [resolvable:$true] %s18_s25 }
   0x3   :  { %s30_s22 = sshll.u32 %s450_s21, 4  ;;  %s451_s26 = smov 64   ;;  %s31_s22 = int_to_ptr.vmem [resolvable:$true] %s30_s22 }
   0x4   :  { %s452_s27 = smov 4   ;;  %s453_s28 = smov [#allocation2]  }
   0x5   :  { %36 = dma.hbm_to_vmem [thread:$0]  %s29_s20, 1024, %s31_s22, [#allocation6], %s451_s26, %s451_s26, %s452_s27  }
   0x6   :  { %s20_s29 = sshll.u32 %s453_s28, 4  ;;  %s43_s7 = sshll.u32 %s507_s3, 4  ;;  %s21_s29 = int_to_ptr.vmem [resolvable:$true] %s20_s29  ;;  %s44_s7 = int_to_ptr.hbm [resolvable:$true] %s43_s7 }
   0x7   :  { %23 = dma.hbm_to_vmem [thread:$0]  %s19_s25, 128, %s21_s29, [#allocation3]  }
   0x8   :  { %s454_s1 = smov [#allocation7]  }
   0x9   :  { %s45_s8 = sshll.u32 %s454_s1, 4  ;;  %s46_s8 = int_to_ptr.vmem [resolvable:$true] %s45_s8 }
   0xa   :  { %51 = dma.hbm_to_vmem [thread:$0]  %s44_s7, 1024, %s46_s8, [#allocation6], %s451_s26, %s451_s26, %s452_s27  }
   0xb   :  { %444 = dma.done.wait [#allocation3], 128  }
   0xc   :  { %445 = vsyncadd [#allocation3], 4294967168 }
   0xd   :  { %446 = dma.done.wait [#allocation6], 2048  }
   0xe   :  { %447 = vsyncadd [#allocation6], 4294965248  ;;  %v327_v0 = vld [vmem:[#allocation5 + $0x38] sm:$0xff]  ;;  %v326_v1 = vld [vmem:[#allocation5 + $0x30] sm:$0xff]  ;;  %s245_s14 = sshll.u32 %s509_s5, 4  ;;  %s246_s14 = int_to_ptr.hbm [resolvable:$true] %s245_s14 }
   0xf   :  { %136 = vmatpush.bf16.msra.mxu0 %v327_v0  ;;  %v335_v2 = vld [vmem:[#allocation7 + $0x38] sm:$0xff]  ;;  %v334_v3 = vld [vmem:[#allocation7 + $0x30] sm:$0xff]  ;;  %v325_v4 = vld [vmem:[#allocation5 + $0x28] sm:$0xff] }
  0x10   :  { %219 = vmatpush.bf16.msra.mxu1 %v335_v2  ;;  %v333_v5 = vld [vmem:[#allocation7 + $0x28] sm:$0xff]  ;;  %v324_v6 = vld [vmem:[#allocation5 + $0x20] sm:$0xff]  ;;  %v323_v8 = vld [vmem:[#allocation5 + $0x18] sm:$0xff] }
  0x11   :  { %v332_v7 = vld [vmem:[#allocation7 + $0x20] sm:$0xff]  ;;  %v331_v9 = vld [vmem:[#allocation7 + $0x18] sm:$0xff]  ;;  %v322_v10 = vld [vmem:[#allocation5 + $0x10] sm:$0xff] }
  0x12   :  { %v330_v11 = vld [vmem:[#allocation7 + $0x10] sm:$0xff]  ;;  %v321_v12 = vld [vmem:[#allocation5 + $0x8] sm:$0xff]  ;;  %v320_v13 = vld [vmem:[#allocation5] sm:$0xff] }
  0x13   :  { %137 = vmatpush.bf16.msra.mxu0 %v326_v1  ;;  %v66_v14 = vld [vmem:[#allocation2] sm:$0xff]  ;;  %v329_v16 = vld [vmem:[#allocation7 + $0x8] sm:$0xff]  ;;  %v328_v17 = vld [vmem:[#allocation7] sm:$0xff] }
  0x14   :  { %220 = vmatpush.bf16.msra.mxu1 %v334_v3  ;;  %v67_v15 = vpack.c.bf16 %v66_v14, %v66_v14  ;;  %v342_v18 = vld [vmem:[%s506_s2] ss:$0 sm:$0xff]  ;;  %s455_s2 = smov [#allocation8]  }
  0x15   :  { %v343_v24 = vld [vmem:[%s508_s4] ss:$0 sm:$0xff]  ;;  %s243_s11 = sshll.u32 %s455_s2, 4  ;;  %s244_s11 = int_to_ptr.vmem [resolvable:$true] %s243_s11 }
  0x17   :  { %138 = vmatpush.bf16.msra.mxu0 %v325_v4 }
  0x18   :  { %221 = vmatpush.bf16.msra.mxu1 %v333_v5 }
  0x1b   :  { %139 = vmatpush.bf16.msra.mxu0 %v324_v6 }
  0x1c   :  { %222 = vmatpush.bf16.msra.mxu1 %v332_v7 }
  0x1f   :  { %140 = vmatpush.bf16.msra.mxu0 %v323_v8 }
  0x20   :  { %223 = vmatpush.bf16.msra.mxu1 %v331_v9 }
  0x23   :  { %141 = vmatpush.bf16.msra.mxu0 %v322_v10 }
  0x24   :  { %224 = vmatpush.bf16.msra.mxu1 %v330_v11 }
  0x27   :  { %142 = vmatpush.bf16.msra.mxu0 %v321_v12 }
  0x28   :  { %225 = vmatpush.bf16.msra.mxu1 %v329_v16 }
  0x2b   :  { %143 = vmatpush.bf16.msra.mxu0 %v320_v13 }
  0x2c   :  { %226 = vmatpush.bf16.msra.mxu1 %v328_v17 }
  0x2e   :  { %144 = vmatmul.bf16.vlgmr.msra.gmra.mxu0 %v67_v15 }
  0xab   :  { %v145_v19 = vpop.f32.mrf.mxu0 }
  0xac   :  { %v146_v20 = vadd.f32 %v342_v18, %v145_v19 }
  0xae   :  { %v149_v21 = vmax.f32 %v146_v20, 0.0 }
  0xb0   :  { %v150_v22 = vpack.c.bf16 %v149_v21, %v149_v21 }
  0xb2   :  { %227 = vmatmul.bf16.vlgmr.msra.gmra.mxu1 %v150_v22 }
  0xb3   :  { %v147_v23 = vpop.f32.mrf.mxu0 }
 0x12f   :  { %v228_v25 = vpop.f32.mrf.mxu1 }
 0x130   :  { %v229_v26 = vadd.f32 %v343_v24, %v228_v25 }
 0x132   :  { %v232_v27 = vsub.f32 0.0, %v229_v26 }
 0x134   :  { %v233_v28 = vmul.f32 1.442695, %v232_v27 }
 0x136   :  { %344 = vpow2.f32 %v233_v28 }
 0x137   :  { %v230_v29 = vpop.f32.mrf.mxu1 }
 0x13c   :  { %v345_v30 = vpop.eup %344 }
 0x13d   :  { %v235_v31 = vadd.f32 1.0, %v345_v30 }
 0x13f   :  { %346 = vrcp.f32 %v235_v31 }
 0x145   :  { %v347_v32 = vpop.eup %346 }
 0x146   :  { %237 = vst [vmem:[#allocation8] sm:$0xff] %v347_v32 }
 0x147   :  { %248 = dma.vmem_to_hbm [thread:$0]  %s244_s11, 128, %s246_s14, [#allocation4]  }
 0x148   :  { %448 = dma.done.wait [#allocation4], 128  }
 0x149   :  { %449 = vsyncadd [#allocation4], 4294967168 }
 0x14a   :  { %253 = vsyncpa [#allocation3], 1 }
 0x14b   :  { %254 = vsyncpa [#allocation6], 1 }
 0x14c   :  { %255 = vsyncpa [#allocation4], 1 }

</bundles_post_ra>
